<compile_context>
chip_gen: v6e
topology: v6e:2x2x1
jax: 0.10.0
libtpu: 0.0.40
codegen_flags: <defaults>
</compile_context>

<pallas_src>
import functools

import jax
import jax.numpy as jnp
from jax.experimental import pallas as pl
from jax.experimental.pallas import tpu as pltpu

D_IN, H1, H2, H3, D_OUT = 1441, 32, 64, 32, 4


def _round_up(x, m):
    return ((x + m - 1) // m) * m


def _mlp_kernel(x_ref,
                w1_ref, b1_ref,
                w2_ref, b2_ref,
                w3_ref, b3_ref,
                w4_ref, b4_ref,
                o_ref):
    """Fused forward pass for one batch tile.

    All four matmuls + ReLUs are done in-kernel; every weight fits easily in
    VMEM (largest is W1: 1441x32, <1 MiB even padded). Accumulation and the
    bias/ReLU math are in f32 regardless of the storage dtype of x / W.
    """
    x = x_ref[...]

    # Layer 1: dominant matmul — runs in the storage dtype (f32 or bf16) on
    # the MXU with f32 accumulation.
    h = jnp.dot(x, w1_ref[...], preferred_element_type=jnp.float32)
    h = h + b1_ref[...].astype(jnp.float32)
    h = jnp.maximum(h, 0.0)

    # Layers 2-4 are tiny; keep activations in f32 and up-cast the weights.
    h = jnp.dot(h, w2_ref[...].astype(jnp.float32),
                preferred_element_type=jnp.float32)
    h = h + b2_ref[...].astype(jnp.float32)
    h = jnp.maximum(h, 0.0)

    h = jnp.dot(h, w3_ref[...].astype(jnp.float32),
                preferred_element_type=jnp.float32)
    h = h + b3_ref[...].astype(jnp.float32)
    h = jnp.maximum(h, 0.0)

    out = jnp.dot(h, w4_ref[...].astype(jnp.float32),
                  preferred_element_type=jnp.float32)
    out = out + b4_ref[...].astype(jnp.float32)
    o_ref[...] = out.astype(o_ref.dtype)


@functools.partial(jax.jit, static_argnames=("block_b",))
def shallow_linear_forward(x, params, *, block_b=512):
    """x: [B, 1441] (f32 or bf16)  ->  [B, 4] float32."""
    (w1, b1), (w2, b2), (w3, b3), (w4, b4) = params
    B = x.shape[0]

    # Clamp the batch tile to the (sublane-aligned) batch, keep it a multiple
    # of 8, and zero-pad the batch to a tile multiple so any B works.
    block_b = _round_up(max(8, min(block_b, _round_up(B, 8))), 8)
    Bp = _round_up(B, block_b)
    if Bp != B:
        x = jnp.pad(x, ((0, Bp - B), (0, 0)))

    grid = (Bp // block_b,)

    # VMEM budget estimate for the chosen tile (double-buffered x + output,
    # resident padded weights, in-kernel f32 intermediates) with headroom.
    itemsize = jnp.dtype(x.dtype).itemsize
    d_in_pad = _round_up(D_IN, 128)                       # 1536 lanes for x/W1
    vmem_est = (
        2 * block_b * d_in_pad * itemsize                 # x tile, double-buffered
        + 2 * block_b * 128 * 4                           # output tile (lane-padded)
        + 2 * itemsize * (_round_up(D_IN, 8) * 128        # W1 padded
                          + 32 * 128 + 64 * 128 + 32 * 128)
        + 2 * 4 * 4 * 128                                 # biases
        + 6 * block_b * 128 * 4                           # f32 intermediates
    )
    vmem_limit = int(min(max(32 * 1024 * 1024, 1.5 * vmem_est),
                         100 * 1024 * 1024))

    full = lambda shape: pl.BlockSpec(shape, lambda i: (0, 0))

    out = pl.pallas_call(
        _mlp_kernel,
        out_shape=jax.ShapeDtypeStruct((Bp, D_OUT), jnp.float32),
        grid_spec=pltpu.PrefetchScalarGridSpec(
            num_scalar_prefetch=0,
            grid=grid,
            in_specs=[
                pl.BlockSpec((block_b, D_IN), lambda i: (i, 0)),   # x tile
                full((D_IN, H1)), full((1, H1)),                   # layer 1
                full((H1, H2)), full((1, H2)),                     # layer 2
                full((H2, H3)), full((1, H3)),                     # layer 3
                full((H3, D_OUT)), full((1, D_OUT)),               # layer 4
            ],
            out_specs=pl.BlockSpec((block_b, D_OUT), lambda i: (i, 0)),
        ),
        compiler_params=pltpu.CompilerParams(
            dimension_semantics=("parallel",),   # shards batch tiles over TCs
            vmem_limit_bytes=vmem_limit,
        ),
    )(x, w1, b1, w2, b2, w3, b3, w4, b4)

    return out[:B]


def init_params(key):
    """Deterministic init mirroring nn.Linear's default U(-1/sqrt(fan_in), +)."""
    dims = [D_IN, H1, H2, H3, D_OUT]
    params = []
    for i in range(4):
        fan_in, fan_out = dims[i], dims[i + 1]
        key, kw, kb = jax.random.split(key, 3)
        bound = 1.0 / jnp.sqrt(jnp.float32(fan_in))
        # stored as [in, out] (transposed vs. PyTorch's [out, in])
        w = jax.random.uniform(kw, (fan_in, fan_out), jnp.float32, -bound, bound)
        b = jax.random.uniform(kb, (1, fan_out), jnp.float32, -bound, bound)
        params.append((w, b))
    return params


def reference_forward(x, params):
    h = x
    for i, (w, b) in enumerate(params):
        h = h @ w + b
        if i < 3:
            h = jnp.maximum(h, 0.0)
    return h


if __name__ == "__main__":
    key = jax.random.PRNGKey(0)
    key, kx = jax.random.split(key)
    params = init_params(key)

    # --- small f32 smoke test (tile clamps to the batch) --------------------
    B_small = 8
    x_small = jax.random.normal(kx, (B_small, D_IN), jnp.float32)
    out = jax.block_until_ready(shallow_linear_forward(x_small, params))
    ref = reference_forward(x_small, params)
    assert out.shape == (B_small, D_OUT), out.shape
    assert jnp.allclose(out, ref, atol=1e-4, rtol=1e-4), "f32 small-batch mismatch"

    # --- multi-tile f32 test: odd batch (padding path) + 4-step grid --------
    key, kx2 = jax.random.split(key)
    B = 200
    x = jax.random.normal(kx2, (B, D_IN), jnp.float32)
    out = jax.block_until_ready(shallow_linear_forward(x, params, block_b=64))
    ref = reference_forward(x, params)
    assert out.shape == (B, D_OUT), out.shape
    assert jnp.allclose(out, ref, atol=1e-4, rtol=1e-4), "f32 tiled mismatch"

    # --- bf16-storage path (halves the dominant x HBM traffic) --------------
    x_bf16 = x.astype(jnp.bfloat16)
    params_bf16 = [(w.astype(jnp.bfloat16), b) for (w, b) in params]
    out_bf = jax.block_until_ready(
        shallow_linear_forward(x_bf16, params_bf16, block_b=64))
    ref_bf = reference_forward(
        x_bf16.astype(jnp.float32),
        [(w.astype(jnp.float32), b) for (w, b) in params_bf16])
    assert out_bf.shape == (B, D_OUT), out_bf.shape
    assert jnp.allclose(out_bf, ref_bf, atol=2e-3, rtol=2e-3), "bf16 mismatch"

    print("KERNEL_OK")
</pallas_src>

<mosaic_0001>
module attributes {stable_mosaic.version = 11 : i64} {
  func.func @_mlp_kernel(%arg0: i32, %arg1: memref<8x1441xf32, #tpu.memory_space<vmem>>, %arg2: memref<1441x32xf32, #tpu.memory_space<vmem>>, %arg3: memref<1x32xf32, #tpu.memory_space<vmem>>, %arg4: memref<32x64xf32, #tpu.memory_space<vmem>>, %arg5: memref<1x64xf32, #tpu.memory_space<vmem>>, %arg6: memref<64x32xf32, #tpu.memory_space<vmem>>, %arg7: memref<1x32xf32, #tpu.memory_space<vmem>>, %arg8: memref<32x4xf32, #tpu.memory_space<vmem>>, %arg9: memref<1x4xf32, #tpu.memory_space<vmem>>, %arg10: memref<8x4xf32, #tpu.memory_space<vmem>>) attributes {dimension_semantics = [#tpu.dimension_semantics<parallel>], iteration_bounds = array<i64: 1>, scalar_prefetch = 0 : i64, scratch_operands = 0 : i64, tpu.core_type = #tpu.core_type<tc>, window_params = [{transform_indices = @transform_0, window_bounds = array<i64: 8, 1441>}, {pipeline_mode = #tpu.pipeline_mode<synchronous>, transform_indices = @transform_1, window_bounds = array<i64: 1441, 32>}, {pipeline_mode = #tpu.pipeline_mode<synchronous>, transform_indices = @transform_2, window_bounds = array<i64: 1, 32>}, {pipeline_mode = #tpu.pipeline_mode<synchronous>, transform_indices = @transform_3, window_bounds = array<i64: 32, 64>}, {pipeline_mode = #tpu.pipeline_mode<synchronous>, transform_indices = @transform_4, window_bounds = array<i64: 1, 64>}, {pipeline_mode = #tpu.pipeline_mode<synchronous>, transform_indices = @transform_5, window_bounds = array<i64: 64, 32>}, {pipeline_mode = #tpu.pipeline_mode<synchronous>, transform_indices = @transform_6, window_bounds = array<i64: 1, 32>}, {pipeline_mode = #tpu.pipeline_mode<synchronous>, transform_indices = @transform_7, window_bounds = array<i64: 32, 4>}, {pipeline_mode = #tpu.pipeline_mode<synchronous>, transform_indices = @transform_8, window_bounds = array<i64: 1, 4>}, {transform_indices = @transform_9, window_bounds = array<i64: 8, 4>}]} {
    %c0 = arith.constant 0 : index
    %c0_0 = arith.constant 0 : index
    %0 = vector.load %arg1[%c0, %c0_0] : memref<8x1441xf32, #tpu.memory_space<vmem>>, vector<8x1441xf32>
    %c0_1 = arith.constant 0 : index
    %c0_2 = arith.constant 0 : index
    %1 = vector.load %arg2[%c0_1, %c0_2] : memref<1441x32xf32, #tpu.memory_space<vmem>>, vector<1441x32xf32>
    %cst = arith.constant dense<0.000000e+00> : vector<8x32xf32>
    %2 = tpu.matmul %0, %1, %cst {dimension_numbers = #tpu.dot_dimension_numbers<[1], [0], [0], [1], [0, 0, 1, 1], [], []>} : vector<8x1441xf32>, vector<1441x32xf32>, vector<8x32xf32> -> vector<8x32xf32>
    %c0_3 = arith.constant 0 : index
    %c0_4 = arith.constant 0 : index
    %3 = vector.load %arg3[%c0_3, %c0_4] : memref<1x32xf32, #tpu.memory_space<vmem>>, vector<1x32xf32>
    %4 = vector.broadcast %3 : vector<1x32xf32> to vector<8x32xf32>
    %5 = arith.addf %2, %4 : vector<8x32xf32>
    %cst_5 = arith.constant 0.000000e+00 : f32
    %6 = vector.broadcast %cst_5 : f32 to vector<8x32xf32>
    %7 = arith.maximumf %5, %6 : vector<8x32xf32>
    %c0_6 = arith.constant 0 : index
    %c0_7 = arith.constant 0 : index
    %8 = vector.load %arg4[%c0_6, %c0_7] : memref<32x64xf32, #tpu.memory_space<vmem>>, vector<32x64xf32>
    %cst_8 = arith.constant dense<0.000000e+00> : vector<8x64xf32>
    %9 = tpu.matmul %7, %8, %cst_8 {dimension_numbers = #tpu.dot_dimension_numbers<[1], [0], [0], [1], [0, 0, 1, 1], [], []>} : vector<8x32xf32>, vector<32x64xf32>, vector<8x64xf32> -> vector<8x64xf32>
    %c0_9 = arith.constant 0 : index
    %c0_10 = arith.constant 0 : index
    %10 = vector.load %arg5[%c0_9, %c0_10] : memref<1x64xf32, #tpu.memory_space<vmem>>, vector<1x64xf32>
    %11 = vector.broadcast %10 : vector<1x64xf32> to vector<8x64xf32>
    %12 = arith.addf %9, %11 : vector<8x64xf32>
    %cst_11 = arith.constant 0.000000e+00 : f32
    %13 = vector.broadcast %cst_11 : f32 to vector<8x64xf32>
    %14 = arith.maximumf %12, %13 : vector<8x64xf32>
    %c0_12 = arith.constant 0 : index
    %c0_13 = arith.constant 0 : index
    %15 = vector.load %arg6[%c0_12, %c0_13] : memref<64x32xf32, #tpu.memory_space<vmem>>, vector<64x32xf32>
    %cst_14 = arith.constant dense<0.000000e+00> : vector<8x32xf32>
    %16 = tpu.matmul %14, %15, %cst_14 {dimension_numbers = #tpu.dot_dimension_numbers<[1], [0], [0], [1], [0, 0, 1, 1], [], []>} : vector<8x64xf32>, vector<64x32xf32>, vector<8x32xf32> -> vector<8x32xf32>
    %c0_15 = arith.constant 0 : index
    %c0_16 = arith.constant 0 : index
    %17 = vector.load %arg7[%c0_15, %c0_16] : memref<1x32xf32, #tpu.memory_space<vmem>>, vector<1x32xf32>
    %18 = vector.broadcast %17 : vector<1x32xf32> to vector<8x32xf32>
    %19 = arith.addf %16, %18 : vector<8x32xf32>
    %cst_17 = arith.constant 0.000000e+00 : f32
    %20 = vector.broadcast %cst_17 : f32 to vector<8x32xf32>
    %21 = arith.maximumf %19, %20 : vector<8x32xf32>
    %c0_18 = arith.constant 0 : index
    %c0_19 = arith.constant 0 : index
    %22 = vector.load %arg8[%c0_18, %c0_19] : memref<32x4xf32, #tpu.memory_space<vmem>>, vector<32x4xf32>
    %cst_20 = arith.constant dense<0.000000e+00> : vector<8x4xf32>
    %23 = tpu.matmul %21, %22, %cst_20 {dimension_numbers = #tpu.dot_dimension_numbers<[1], [0], [0], [1], [0, 0, 1, 1], [], []>} : vector<8x32xf32>, vector<32x4xf32>, vector<8x4xf32> -> vector<8x4xf32>
    %c0_21 = arith.constant 0 : index
    %c0_22 = arith.constant 0 : index
    %24 = vector.load %arg9[%c0_21, %c0_22] : memref<1x4xf32, #tpu.memory_space<vmem>>, vector<1x4xf32>
    %25 = vector.broadcast %24 : vector<1x4xf32> to vector<8x4xf32>
    %26 = arith.addf %23, %25 : vector<8x4xf32>
    %c0_23 = arith.constant 0 : index
    %c0_24 = arith.constant 0 : index
    %27 = vector.load %arg10[%c0_23, %c0_24] : memref<8x4xf32, #tpu.memory_space<vmem>>, vector<8x4xf32>
    tpu.vector_store %arg10[%c0_23, %c0_24], %26 {strides = array<i32>} : memref<8x4xf32, #tpu.memory_space<vmem>>, vector<8x4xf32>,
    return
  }
  func.func @transform_0(%arg0: i32) -> (i32, i32) {
    %c0_i32 = arith.constant 0 : i32
    %c0_i32_0 = arith.constant 0 : i32
    return %arg0, %c0_i32 : i32, i32
  }
  func.func @transform_1(%arg0: i32) -> (i32, i32) {
    %c0_i32 = arith.constant 0 : i32
    %c0_i32_0 = arith.constant 0 : i32
    %c0_i32_1 = arith.constant 0 : i32
    return %c0_i32, %c0_i32_0 : i32, i32
  }
  func.func @transform_2(%arg0: i32) -> (i32, i32) {
    %c0_i32 = arith.constant 0 : i32
    %c0_i32_0 = arith.constant 0 : i32
    %c0_i32_1 = arith.constant 0 : i32
    return %c0_i32, %c0_i32_0 : i32, i32
  }
  func.func @transform_3(%arg0: i32) -> (i32, i32) {
    %c0_i32 = arith.constant 0 : i32
    %c0_i32_0 = arith.constant 0 : i32
    %c0_i32_1 = arith.constant 0 : i32
    return %c0_i32, %c0_i32_0 : i32, i32
  }
  func.func @transform_4(%arg0: i32) -> (i32, i32) {
    %c0_i32 = arith.constant 0 : i32
    %c0_i32_0 = arith.constant 0 : i32
    %c0_i32_1 = arith.constant 0 : i32
    return %c0_i32, %c0_i32_0 : i32, i32
  }
  func.func @transform_5(%arg0: i32) -> (i32, i32) {
    %c0_i32 = arith.constant 0 : i32
    %c0_i32_0 = arith.constant 0 : i32
    %c0_i32_1 = arith.constant 0 : i32
    return %c0_i32, %c0_i32_0 : i32, i32
  }
  func.func @transform_6(%arg0: i32) -> (i32, i32) {
    %c0_i32 = arith.constant 0 : i32
    %c0_i32_0 = arith.constant 0 : i32
    %c0_i32_1 = arith.constant 0 : i32
    return %c0_i32, %c0_i32_0 : i32, i32
  }
  func.func @transform_7(%arg0: i32) -> (i32, i32) {
    %c0_i32 = arith.constant 0 : i32
    %c0_i32_0 = arith.constant 0 : i32
    %c0_i32_1 = arith.constant 0 : i32
    return %c0_i32, %c0_i32_0 : i32, i32
  }
  func.func @transform_8(%arg0: i32) -> (i32, i32) {
    %c0_i32 = arith.constant 0 : i32
    %c0_i32_0 = arith.constant 0 : i32
    %c0_i32_1 = arith.constant 0 : i32
    return %c0_i32, %c0_i32_0 : i32, i32
  }
  func.func @transform_9(%arg0: i32) -> (i32, i32) {
    %c0_i32 = arith.constant 0 : i32
    %c0_i32_0 = arith.constant 0 : i32
    return %arg0, %c0_i32 : i32, i32
  }
}

</mosaic_0001>

<bundles_post_ra>
// kernel: shallow_linear_forward.1
= control target key start
LH: loop header
LB: loop body
LE: loop exit
PB: predicated region body
PF: predicated region fallthrough
CT: control target
= control target key end

     0   :  { %vm232_vm0 = vcmask 269312   ;;  %vm236_vm1 = vcmask 1040384   ;;  %vm1174_vm2 = vmmov 0   ;;  %vm672_vm3 = vcmask 261120   ;;  %s1912_s1 = inlined_call_operand.vmem [shape: f32[1441,32], index: 1, kind: input, shape index: {}]   ;;  %s1913_s0 = inlined_call_operand.vmem [shape: f32[8,1441], index: 0, kind: input, shape index: {}]   ;;  %s1914_s3 = inlined_call_operand.vmem [shape: f32[32,64], index: 3, kind: input, shape index: {}]   ;;  %s1915_s2 = inlined_call_operand.vmem [shape: f32[1,32], index: 2, kind: input, shape index: {}]   ;;  %s1916_s5 = inlined_call_operand.vmem [shape: f32[64,32], index: 5, kind: input, shape index: {}]   ;;  %s1917_s7 = inlined_call_operand.vmem [shape: f32[32,4], index: 7, kind: input, shape index: {}]   ;;  %s1918_s4 = inlined_call_operand.vmem [shape: f32[1,64], index: 4, kind: input, shape index: {}]   ;;  %s1919_s6 = inlined_call_operand.vmem [shape: f32[1,32], index: 6, kind: input, shape index: {}]   ;;  %s1920_s8 = inlined_call_operand.vmem [shape: f32[1,4], index: 8, kind: input, shape index: {}]   ;;  %s1921_s9 = inlined_call_operand.vmem [shape: f32[8,4], index: 9, kind: output, shape index: {}]  }
   0x1   :  { %v75_v0 = vld [vmem:[%s1912_s1 + $0xf8] sm:$0xff]  ;;  %v74_v4 = vld [vmem:[%s1912_s1 + $0xf0] sm:$0xff]  ;;  %v73_v8 = vld [vmem:[%s1912_s1 + $0xe8] sm:$0xff]  ;;  %vm762_vm4 = vcmask 523264   ;;  %vm921_vm5 = vcmask 31744  }
   0x2   :  { %v107_v1 = vld [vmem:[%s1912_s1 + $0x1f8] sm:$0xff]  ;;  %936 = vmatprep.subr.mxu0 %v75_v0  ;;  %v106_v5 = vld [vmem:[%s1912_s1 + $0x1f0] sm:$0xff]  ;;  %v105_v9 = vld [vmem:[%s1912_s1 + $0x1e8] sm:$0xff] }
   0x3   :  { %v59_v2 = vld [vmem:[%s1912_s1 + $0x78] sm:$0xff]  ;;  %971 = vmatprep.subr.mxu1 %v107_v1  ;;  %v58_v6 = vld [vmem:[%s1912_s1 + $0x70] sm:$0xff]  ;;  %v57_v10 = vld [vmem:[%s1912_s1 + $0x68] sm:$0xff] }
   0x4   :  { %v91_v3 = vld [vmem:[%s1912_s1 + $0x178] sm:$0xff]  ;;  %937 = vmatpush3.msra.mxu0 %v59_v2  ;;  %v90_v7 = vld [vmem:[%s1912_s1 + $0x170] sm:$0xff]  ;;  %v89_v11 = vld [vmem:[%s1912_s1 + $0x168] sm:$0xff] }
   0x5   :  { %972 = vmatpush3.msra.mxu1 %v91_v3  ;;  %938 = vmatprep.subr.mxu0 %v74_v4  ;;  %v72_v12 = vld [vmem:[%s1912_s1 + $0xe0] sm:$0xff]  ;;  %v71_v16 = vld [vmem:[%s1912_s1 + $0xd8] sm:$0xff]  ;;  %v70_v20 = vld [vmem:[%s1912_s1 + $0xd0] sm:$0xff] }
   0x6   :  { %973 = vmatprep.subr.mxu1 %v106_v5  ;;  %939 = vmatpush3.msra.mxu0 %v58_v6  ;;  %v104_v13 = vld [vmem:[%s1912_s1 + $0x1e0] sm:$0xff]  ;;  %v103_v17 = vld [vmem:[%s1912_s1 + $0x1d8] sm:$0xff]  ;;  %v102_v21 = vld [vmem:[%s1912_s1 + $0x1d0] sm:$0xff] }
   0x7   :  { %974 = vmatpush3.msra.mxu1 %v90_v7  ;;  %940 = vmatprep.subr.mxu0 %v73_v8  ;;  %v56_v14 = vld [vmem:[%s1912_s1 + $0x60] sm:$0xff]  ;;  %v55_v18 = vld [vmem:[%s1912_s1 + $0x58] sm:$0xff]  ;;  %v54_v22 = vld [vmem:[%s1912_s1 + $0x50] sm:$0xff] }
   0x8   :  { %975 = vmatprep.subr.mxu1 %v105_v9  ;;  %v88_v15 = vld [vmem:[%s1912_s1 + $0x160] sm:$0xff]  ;;  %941 = vmatpush3.msra.mxu0 %v57_v10  ;;  %v87_v19 = vld [vmem:[%s1912_s1 + $0x158] sm:$0xff]  ;;  %v86_v23 = vld [vmem:[%s1912_s1 + $0x150] sm:$0xff] }
   0x9   :  { %976 = vmatpush3.msra.mxu1 %v89_v11  ;;  %942 = vmatprep.subr.mxu0 %v72_v12  ;;  %v69_v24 = vld [vmem:[%s1912_s1 + $0xc8] sm:$0xff]  ;;  %v68_v28 = vld [vmem:[%s1912_s1 + $0xc0] sm:$0xff]  ;;  %v67_v32 = vld [vmem:[%s1912_s1 + $0xb8] sm:$0xff] }
   0xa   :  { %977 = vmatprep.subr.mxu1 %v104_v13  ;;  %943 = vmatpush3.msra.mxu0 %v56_v14  ;;  %v101_v25 = vld [vmem:[%s1912_s1 + $0x1c8] sm:$0xff]  ;;  %v100_v29 = vld [vmem:[%s1912_s1 + $0x1c0] sm:$0xff]  ;;  %v99_v33 = vld [vmem:[%s1912_s1 + $0x1b8] sm:$0xff] }
   0xb   :  { %978 = vmatpush3.msra.mxu1 %v88_v15  ;;  %944 = vmatprep.subr.mxu0 %v71_v16  ;;  %v53_v26 = vld [vmem:[%s1912_s1 + $0x48] sm:$0xff]  ;;  %v52_v30 = vld [vmem:[%s1912_s1 + $0x40] sm:$0xff]  ;;  %v51_v34 = vld [vmem:[%s1912_s1 + $0x38] sm:$0xff] }
   0xc   :  { %979 = vmatprep.subr.mxu1 %v103_v17  ;;  %945 = vmatpush3.msra.mxu0 %v55_v18  ;;  %v85_v27 = vld [vmem:[%s1912_s1 + $0x148] sm:$0xff]  ;;  %v84_v31 = vld [vmem:[%s1912_s1 + $0x140] sm:$0xff]  ;;  %v83_v35 = vld [vmem:[%s1912_s1 + $0x138] sm:$0xff] }
   0xd   :  { %980 = vmatpush3.msra.mxu1 %v87_v19  ;;  %946 = vmatprep.subr.mxu0 %v70_v20  ;;  %v66_v36 = vld [vmem:[%s1912_s1 + $0xb0] sm:$0xff]  ;;  %v65_v40 = vld [vmem:[%s1912_s1 + $0xa8] sm:$0xff]  ;;  %v64_v44 = vld [vmem:[%s1912_s1 + $0xa0] sm:$0xff] }
   0xe   :  { %981 = vmatprep.subr.mxu1 %v102_v21  ;;  %947 = vmatpush3.msra.mxu0 %v54_v22  ;;  %v98_v37 = vld [vmem:[%s1912_s1 + $0x1b0] sm:$0xff]  ;;  %v97_v41 = vld [vmem:[%s1912_s1 + $0x1a8] sm:$0xff]  ;;  %v96_v45 = vld [vmem:[%s1912_s1 + $0x1a0] sm:$0xff] }
   0xf   :  { %982 = vmatpush3.msra.mxu1 %v86_v23  ;;  %948 = vmatprep.subr.mxu0 %v69_v24  ;;  %v50_v38 = vld [vmem:[%s1912_s1 + $0x30] sm:$0xff]  ;;  %v49_v42 = vld [vmem:[%s1912_s1 + $0x28] sm:$0xff]  ;;  %v48_v46 = vld [vmem:[%s1912_s1 + $0x20] sm:$0xff] }
  0x10   :  { %983 = vmatprep.subr.mxu1 %v101_v25  ;;  %949 = vmatpush3.msra.mxu0 %v53_v26  ;;  %v82_v39 = vld [vmem:[%s1912_s1 + $0x130] sm:$0xff]  ;;  %v81_v43 = vld [vmem:[%s1912_s1 + $0x128] sm:$0xff]  ;;  %v80_v47 = vld [vmem:[%s1912_s1 + $0x120] sm:$0xff] }
  0x11   :  { %984 = vmatpush3.msra.mxu1 %v85_v27  ;;  %950 = vmatprep.subr.mxu0 %v68_v28  ;;  %v63_v48 = vld [vmem:[%s1912_s1 + $0x98] sm:$0xff]  ;;  %v62_v52 = vld [vmem:[%s1912_s1 + $0x90] sm:$0xff]  ;;  %v61_v56 = vld [vmem:[%s1912_s1 + $0x88] sm:$0xff] }
  0x12   :  { %985 = vmatprep.subr.mxu1 %v100_v29  ;;  %951 = vmatpush3.msra.mxu0 %v52_v30  ;;  %v95_v49 = vld [vmem:[%s1912_s1 + $0x198] sm:$0xff]  ;;  %v94_v53 = vld [vmem:[%s1912_s1 + $0x190] sm:$0xff]  ;;  %v93_v57 = vld [vmem:[%s1912_s1 + $0x188] sm:$0xff] }
  0x13   :  { %986 = vmatpush3.msra.mxu1 %v84_v31  ;;  %952 = vmatprep.subr.mxu0 %v67_v32  ;;  %v47_v50 = vld [vmem:[%s1912_s1 + $0x18] sm:$0xff]  ;;  %v46_v54 = vld [vmem:[%s1912_s1 + $0x10] sm:$0xff]  ;;  %v45_v58 = vld [vmem:[%s1912_s1 + $0x8] sm:$0xff] }
  0x14   :  { %987 = vmatprep.subr.mxu1 %v99_v33  ;;  %953 = vmatpush3.msra.mxu0 %v51_v34  ;;  %v79_v51 = vld [vmem:[%s1912_s1 + $0x118] sm:$0xff]  ;;  %v78_v55 = vld [vmem:[%s1912_s1 + $0x110] sm:$0xff]  ;;  %v77_v59 = vld [vmem:[%s1912_s1 + $0x108] sm:$0xff] }
  0x15   :  { %988 = vmatpush3.msra.mxu1 %v83_v35  ;;  %954 = vmatprep.subr.mxu0 %v66_v36  ;;  %v60_v60 = vld [vmem:[%s1912_s1 + $0x80] sm:$0xff]  ;;  %v33_v63 = vld [vmem:[%s1913_s0 + $0x8] sm:$0xff]  ;;  %v35_v1 = vld [vmem:[%s1913_s0 + $0x18] sm:$0xff] }
  0x16   :  { %989 = vmatprep.subr.mxu1 %v98_v37  ;;  %955 = vmatpush3.msra.mxu0 %v50_v38  ;;  %v92_v61 = vld [vmem:[%s1912_s1 + $0x180] sm:$0xff]  ;;  %v34_v3 = vld [vmem:[%s1913_s0 + $0x10] sm:$0xff]  ;;  %v139_v4 = vld [vmem:[%s1912_s1 + $0x2f8] sm:$0xff] }
  0x17   :  { %990 = vmatpush3.msra.mxu1 %v82_v39  ;;  %956 = vmatprep.subr.mxu0 %v65_v40  ;;  %v44_v62 = vld [vmem:[%s1912_s1] sm:$0xff]  ;;  %v171_v5 = vld [vmem:[%s1912_s1 + $0x3f8] sm:$0xff]  ;;  %v138_v8 = vld [vmem:[%s1912_s1 + $0x2f0] sm:$0xff] }
  0x18   :  { %991 = vmatprep.subr.mxu1 %v97_v41  ;;  %957 = vmatpush3.msra.mxu0 %v49_v42  ;;  %v76_v0 = vld [vmem:[%s1912_s1 + $0x100] sm:$0xff]  ;;  %v123_v6 = vld [vmem:[%s1912_s1 + $0x278] sm:$0xff]  ;;  %v170_v9 = vld [vmem:[%s1912_s1 + $0x3f0] sm:$0xff] }
  0x19   :  { %992 = vmatpush3.msra.mxu1 %v81_v43  ;;  %958 = vmatprep.subr.mxu0 %v64_v44  ;;  %v32_v2 = vld [vmem:[%s1913_s0] sm:$0xff]  ;;  %v155_v7 = vld [vmem:[%s1912_s1 + $0x378] sm:$0xff]  ;;  %v122_v10 = vld [vmem:[%s1912_s1 + $0x270] sm:$0xff] }
  0x1a   :  { %993 = vmatprep.subr.mxu1 %v96_v45  ;;  %959 = vmatpush3.msra.mxu0 %v48_v46  ;;  %v154_v11 = vld [vmem:[%s1912_s1 + $0x370] sm:$0xff]  ;;  %v137_v12 = vld [vmem:[%s1912_s1 + $0x2e8] sm:$0xff]  ;;  %v136_v16 = vld [vmem:[%s1912_s1 + $0x2e0] sm:$0xff] }
  0x1b   :  { %994 = vmatpush3.msra.mxu1 %v80_v47  ;;  %960 = vmatprep.subr.mxu0 %v63_v48  ;;  %v169_v13 = vld [vmem:[%s1912_s1 + $0x3e8] sm:$0xff]  ;;  %v168_v17 = vld [vmem:[%s1912_s1 + $0x3e0] sm:$0xff]  ;;  %v135_v20 = vld [vmem:[%s1912_s1 + $0x2d8] sm:$0xff] }
  0x1c   :  { %995 = vmatprep.subr.mxu1 %v95_v49  ;;  %961 = vmatpush3.msra.mxu0 %v47_v50  ;;  %v121_v14 = vld [vmem:[%s1912_s1 + $0x268] sm:$0xff]  ;;  %v120_v18 = vld [vmem:[%s1912_s1 + $0x260] sm:$0xff]  ;;  %v167_v21 = vld [vmem:[%s1912_s1 + $0x3d8] sm:$0xff] }
  0x1d   :  { %996 = vmatpush3.msra.mxu1 %v79_v51  ;;  %962 = vmatprep.subr.mxu0 %v62_v52  ;;  %v153_v15 = vld [vmem:[%s1912_s1 + $0x368] sm:$0xff]  ;;  %v152_v19 = vld [vmem:[%s1912_s1 + $0x360] sm:$0xff]  ;;  %v119_v22 = vld [vmem:[%s1912_s1 + $0x258] sm:$0xff] }
  0x1e   :  { %997 = vmatprep.subr.mxu1 %v94_v53  ;;  %963 = vmatpush3.msra.mxu0 %v46_v54  ;;  %v151_v23 = vld [vmem:[%s1912_s1 + $0x358] sm:$0xff]  ;;  %v134_v24 = vld [vmem:[%s1912_s1 + $0x2d0] sm:$0xff]  ;;  %v133_v28 = vld [vmem:[%s1912_s1 + $0x2c8] sm:$0xff] }
  0x1f   :  { %998 = vmatpush3.msra.mxu1 %v78_v55  ;;  %964 = vmatprep.subr.mxu0 %v61_v56  ;;  %v166_v25 = vld [vmem:[%s1912_s1 + $0x3d0] sm:$0xff]  ;;  %v165_v29 = vld [vmem:[%s1912_s1 + $0x3c8] sm:$0xff]  ;;  %v132_v32 = vld [vmem:[%s1912_s1 + $0x2c0] sm:$0xff] }
  0x20   :  { %999 = vmatprep.subr.mxu1 %v93_v57  ;;  %965 = vmatpush3.msra.mxu0 %v45_v58  ;;  %v118_v26 = vld [vmem:[%s1912_s1 + $0x250] sm:$0xff]  ;;  %v117_v30 = vld [vmem:[%s1912_s1 + $0x248] sm:$0xff]  ;;  %v164_v33 = vld [vmem:[%s1912_s1 + $0x3c0] sm:$0xff] }
  0x21   :  { %1000 = vmatpush3.msra.mxu1 %v77_v59  ;;  %966 = vmatprep.subr.mxu0 %v60_v60  ;;  %v150_v27 = vld [vmem:[%s1912_s1 + $0x350] sm:$0xff]  ;;  %v149_v31 = vld [vmem:[%s1912_s1 + $0x348] sm:$0xff]  ;;  %v116_v34 = vld [vmem:[%s1912_s1 + $0x240] sm:$0xff] }
  0x22   :  { %1001 = vmatprep.subr.mxu1 %v92_v61  ;;  %967 = vmatpush3.msra.mxu0 %v44_v62  ;;  %v148_v35 = vld [vmem:[%s1912_s1 + $0x340] sm:$0xff]  ;;  %v131_v36 = vld [vmem:[%s1912_s1 + $0x2b8] sm:$0xff]  ;;  %v130_v40 = vld [vmem:[%s1912_s1 + $0x2b0] sm:$0xff] }
  0x23   :  { %304 = vmatprep.mubr.f32.mxu0 %v33_v63  ;;  %1002 = vmatpush3.msra.mxu1 %v76_v0  ;;  %v163_v37 = vld [vmem:[%s1912_s1 + $0x3b8] sm:$0xff]  ;;  %v162_v41 = vld [vmem:[%s1912_s1 + $0x3b0] sm:$0xff]  ;;  %v129_v44 = vld [vmem:[%s1912_s1 + $0x2a8] sm:$0xff] }
  0x24   :  { %374 = vmatprep.mubr.f32.mxu1 %v35_v1  ;;  %305 = vmatmul.mubr.f32.vlgmr.msra.gmra.mxu0 %v32_v2  ;;  %v115_v38 = vld [vmem:[%s1912_s1 + $0x238] sm:$0xff]  ;;  %v114_v42 = vld [vmem:[%s1912_s1 + $0x230] sm:$0xff]  ;;  %v161_v45 = vld [vmem:[%s1912_s1 + $0x3a8] sm:$0xff] }
  0x25   :  { %375 = vmatmul.mubr.f32.vlgmr.msra.gmra.mxu1 %v34_v3  ;;  %1006 = vmatprep.subr.mxu0 %v139_v4  ;;  %v147_v39 = vld [vmem:[%s1912_s1 + $0x338] sm:$0xff]  ;;  %v146_v43 = vld [vmem:[%s1912_s1 + $0x330] sm:$0xff]  ;;  %v113_v46 = vld [vmem:[%s1912_s1 + $0x228] sm:$0xff] }
  0x26   :  { %1041 = vmatprep.subr.mxu1 %v171_v5  ;;  %1007 = vmatpush3.msra.mxu0 %v123_v6  ;;  %v145_v47 = vld [vmem:[%s1912_s1 + $0x328] sm:$0xff]  ;;  %v128_v48 = vld [vmem:[%s1912_s1 + $0x2a0] sm:$0xff]  ;;  %v127_v52 = vld [vmem:[%s1912_s1 + $0x298] sm:$0xff] }
  0x27   :  { %1042 = vmatpush3.msra.mxu1 %v155_v7  ;;  %1008 = vmatprep.subr.mxu0 %v138_v8  ;;  %v160_v49 = vld [vmem:[%s1912_s1 + $0x3a0] sm:$0xff]  ;;  %v159_v53 = vld [vmem:[%s1912_s1 + $0x398] sm:$0xff]  ;;  %v126_v56 = vld [vmem:[%s1912_s1 + $0x290] sm:$0xff] }
  0x28   :  { %1043 = vmatprep.subr.mxu1 %v170_v9  ;;  %1009 = vmatpush3.msra.mxu0 %v122_v10  ;;  %v112_v50 = vld [vmem:[%s1912_s1 + $0x220] sm:$0xff]  ;;  %v111_v54 = vld [vmem:[%s1912_s1 + $0x218] sm:$0xff]  ;;  %v158_v57 = vld [vmem:[%s1912_s1 + $0x390] sm:$0xff] }
  0x29   :  { %1044 = vmatpush3.msra.mxu1 %v154_v11  ;;  %1010 = vmatprep.subr.mxu0 %v137_v12  ;;  %v144_v51 = vld [vmem:[%s1912_s1 + $0x320] sm:$0xff]  ;;  %v143_v55 = vld [vmem:[%s1912_s1 + $0x318] sm:$0xff]  ;;  %v110_v58 = vld [vmem:[%s1912_s1 + $0x210] sm:$0xff]  ;;  %v1173_v12 = vmov 0.0  }
  0x2a   :  { %1045 = vmatprep.subr.mxu1 %v169_v13  ;;  %1011 = vmatpush3.msra.mxu0 %v121_v14  ;;  %v142_v59 = vld [vmem:[%s1912_s1 + $0x310] sm:$0xff]  ;;  %v125_v60 = vld [vmem:[%s1912_s1 + $0x288] sm:$0xff]  ;;  %v124_v0 = vld [vmem:[%s1912_s1 + $0x280] sm:$0xff] }
  0x2b   :  { %1046 = vmatpush3.msra.mxu1 %v153_v15  ;;  %1012 = vmatprep.subr.mxu0 %v136_v16  ;;  %v157_v61 = vld [vmem:[%s1912_s1 + $0x388] sm:$0xff]  ;;  %v156_v1 = vld [vmem:[%s1912_s1 + $0x380] sm:$0xff]  ;;  %v39_v5 = vld [vmem:[%s1913_s0 + $0x38] sm:$0xff] }
  0x2c   :  { %1047 = vmatprep.subr.mxu1 %v168_v17  ;;  %1013 = vmatpush3.msra.mxu0 %v120_v18  ;;  %v109_v62 = vld [vmem:[%s1912_s1 + $0x208] sm:$0xff]  ;;  %v108_v2 = vld [vmem:[%s1912_s1 + $0x200] sm:$0xff]  ;;  %v38_v7 = vld [vmem:[%s1913_s0 + $0x30] sm:$0xff] }
  0x2d   :  { %1048 = vmatpush3.msra.mxu1 %v152_v19  ;;  %1014 = vmatprep.subr.mxu0 %v135_v20  ;;  %v141_v63 = vld [vmem:[%s1912_s1 + $0x308] sm:$0xff]  ;;  %v140_v4 = vld [vmem:[%s1912_s1 + $0x300] sm:$0xff]  ;;  %v203_v8 = vld [vmem:[%s1912_s1 + $0x4f8] sm:$0xff] }
  0x2e   :  { %1049 = vmatprep.subr.mxu1 %v167_v21  ;;  %1015 = vmatpush3.msra.mxu0 %v119_v22  ;;  %v37_v3 = vld [vmem:[%s1913_s0 + $0x28] sm:$0xff]  ;;  %v36_v6 = vld [vmem:[%s1913_s0 + $0x20] sm:$0xff]  ;;  %v187_v9 = vld [vmem:[%s1912_s1 + $0x478] sm:$0xff] }
  0x2f   :  { %1050 = vmatpush3.msra.mxu1 %v151_v23  ;;  %1016 = vmatprep.subr.mxu0 %v134_v24  ;;  %v219_v10 = vld [vmem:[%s1912_s1 + $0x578] sm:$0xff]  ;;  %v202_v11 = vld [vmem:[%s1912_s1 + $0x4f0] sm:$0xff]  ;;  %v201_v15 = vld [vmem:[%s1912_s1 + $0x4e8] sm:$0xff] }
  0x30   :  { %1051 = vmatprep.subr.mxu1 %v166_v25  ;;  %1017 = vmatpush3.msra.mxu0 %v118_v26  ;;  %v186_v13 = vld [vmem:[%s1912_s1 + $0x470] sm:$0xff]  ;;  %v185_v16 = vld [vmem:[%s1912_s1 + $0x468] sm:$0xff]  ;;  %v200_v18 = vld [vmem:[%s1912_s1 + $0x4e0] sm:$0xff] }
  0x31   :  { %1052 = vmatpush3.msra.mxu1 %v150_v27  ;;  %1018 = vmatprep.subr.mxu0 %v133_v28  ;;  %v218_v14 = vld [vmem:[%s1912_s1 + $0x570] sm:$0xff]  ;;  %v217_v17 = vld [vmem:[%s1912_s1 + $0x568] sm:$0xff]  ;;  %v184_v19 = vld [vmem:[%s1912_s1 + $0x460] sm:$0xff] }
  0x32   :  { %1053 = vmatprep.subr.mxu1 %v165_v29  ;;  %1019 = vmatpush3.msra.mxu0 %v117_v30  ;;  %v216_v20 = vld [vmem:[%s1912_s1 + $0x560] sm:$0xff]  ;;  %v199_v21 = vld [vmem:[%s1912_s1 + $0x4d8] sm:$0xff]  ;;  %v198_v24 = vld [vmem:[%s1912_s1 + $0x4d0] sm:$0xff] }
  0x33   :  { %1054 = vmatpush3.msra.mxu1 %v149_v31  ;;  %1020 = vmatprep.subr.mxu0 %v132_v32  ;;  %v183_v22 = vld [vmem:[%s1912_s1 + $0x458] sm:$0xff]  ;;  %v182_v25 = vld [vmem:[%s1912_s1 + $0x450] sm:$0xff]  ;;  %v197_v27 = vld [vmem:[%s1912_s1 + $0x4c8] sm:$0xff] }
  0x34   :  { %1055 = vmatprep.subr.mxu1 %v164_v33  ;;  %1021 = vmatpush3.msra.mxu0 %v116_v34  ;;  %v215_v23 = vld [vmem:[%s1912_s1 + $0x558] sm:$0xff]  ;;  %v214_v26 = vld [vmem:[%s1912_s1 + $0x550] sm:$0xff]  ;;  %v181_v28 = vld [vmem:[%s1912_s1 + $0x448] sm:$0xff] }
  0x35   :  { %1056 = vmatpush3.msra.mxu1 %v148_v35  ;;  %1022 = vmatprep.subr.mxu0 %v131_v36  ;;  %v213_v29 = vld [vmem:[%s1912_s1 + $0x548] sm:$0xff]  ;;  %v196_v30 = vld [vmem:[%s1912_s1 + $0x4c0] sm:$0xff]  ;;  %v195_v33 = vld [vmem:[%s1912_s1 + $0x4b8] sm:$0xff] }
  0x36   :  { %1057 = vmatprep.subr.mxu1 %v163_v37  ;;  %1023 = vmatpush3.msra.mxu0 %v115_v38  ;;  %v180_v31 = vld [vmem:[%s1912_s1 + $0x440] sm:$0xff]  ;;  %v179_v34 = vld [vmem:[%s1912_s1 + $0x438] sm:$0xff]  ;;  %v194_v36 = vld [vmem:[%s1912_s1 + $0x4b0] sm:$0xff] }
  0x37   :  { %1058 = vmatpush3.msra.mxu1 %v147_v39  ;;  %1024 = vmatprep.subr.mxu0 %v130_v40  ;;  %v212_v32 = vld [vmem:[%s1912_s1 + $0x540] sm:$0xff]  ;;  %v211_v35 = vld [vmem:[%s1912_s1 + $0x538] sm:$0xff]  ;;  %v178_v37 = vld [vmem:[%s1912_s1 + $0x430] sm:$0xff] }
  0x38   :  { %1059 = vmatprep.subr.mxu1 %v162_v41  ;;  %1025 = vmatpush3.msra.mxu0 %v114_v42  ;;  %v210_v38 = vld [vmem:[%s1912_s1 + $0x530] sm:$0xff]  ;;  %v193_v39 = vld [vmem:[%s1912_s1 + $0x4a8] sm:$0xff]  ;;  %v192_v42 = vld [vmem:[%s1912_s1 + $0x4a0] sm:$0xff] }
  0x39   :  { %1060 = vmatpush3.msra.mxu1 %v146_v43  ;;  %1026 = vmatprep.subr.mxu0 %v129_v44  ;;  %v177_v40 = vld [vmem:[%s1912_s1 + $0x428] sm:$0xff]  ;;  %v176_v43 = vld [vmem:[%s1912_s1 + $0x420] sm:$0xff] }
  0x3a   :  { %1061 = vmatprep.subr.mxu1 %v161_v45  ;;  %1027 = vmatpush3.msra.mxu0 %v113_v46  ;;  %v209_v41 = vld [vmem:[%s1912_s1 + $0x528] sm:$0xff]  ;;  %v208_v44 = vld [vmem:[%s1912_s1 + $0x520] sm:$0xff]  ;;  %v191_v45 = vld [vmem:[%s1912_s1 + $0x498] sm:$0xff] }
  0x3b   :  { %1062 = vmatpush3.msra.mxu1 %v145_v47  ;;  %1028 = vmatprep.subr.mxu0 %v128_v48  ;;  %v175_v46 = vld [vmem:[%s1912_s1 + $0x418] sm:$0xff]  ;;  %v190_v48 = vld [vmem:[%s1912_s1 + $0x490] sm:$0xff] }
  0x3c   :  { %1063 = vmatprep.subr.mxu1 %v160_v49  ;;  %1029 = vmatpush3.msra.mxu0 %v112_v50  ;;  %v207_v47 = vld [vmem:[%s1912_s1 + $0x518] sm:$0xff]  ;;  %v174_v49 = vld [vmem:[%s1912_s1 + $0x410] sm:$0xff] }
  0x3d   :  { %1064 = vmatpush3.msra.mxu1 %v144_v51  ;;  %1030 = vmatprep.subr.mxu0 %v127_v52  ;;  %v206_v50 = vld [vmem:[%s1912_s1 + $0x510] sm:$0xff]  ;;  %v189_v51 = vld [vmem:[%s1912_s1 + $0x488] sm:$0xff] }
  0x3e   :  { %1065 = vmatprep.subr.mxu1 %v159_v53  ;;  %1031 = vmatpush3.msra.mxu0 %v111_v54  ;;  %v173_v52 = vld [vmem:[%s1912_s1 + $0x408] sm:$0xff]  ;;  %v188_v54 = vld [vmem:[%s1912_s1 + $0x480] sm:$0xff] }
  0x3f   :  { %1066 = vmatpush3.msra.mxu1 %v143_v55  ;;  %1032 = vmatprep.subr.mxu0 %v126_v56  ;;  %v205_v53 = vld [vmem:[%s1912_s1 + $0x508] sm:$0xff]  ;;  %v172_v55 = vld [vmem:[%s1912_s1 + $0x400] sm:$0xff] }
  0x40   :  { %1067 = vmatprep.subr.mxu1 %v158_v57  ;;  %1033 = vmatpush3.msra.mxu0 %v110_v58  ;;  %v41_v56 = vld [vmem:[%s1913_s0 + $0x48] sm:$0xff]  ;;  %v204_v57 = vld [vmem:[%s1912_s1 + $0x500] sm:$0xff] }
  0x41   :  { %1068 = vmatpush3.msra.mxu1 %v142_v59  ;;  %1034 = vmatprep.subr.mxu0 %v125_v60  ;;  %v40_v58 = vld [vmem:[%s1913_s0 + $0x40] sm:$0xff]  ;;  %v43_v59 = vld [vmem:[%s1913_s0 + $0x58] sm:$0xff] }
  0x42   :  { %1069 = vmatprep.subr.mxu1 %v157_v61  ;;  %1035 = vmatpush3.msra.mxu0 %v109_v62  ;;  %v224_v60 = vld [vmem:[%s1912_s1 + $0x5a0] sm:$0x1]  ;;  %v223_v61 = vld [vmem:[%s1912_s1 + $0x598] sm:$0xff]  ;;  %v222_v62 = vld [vmem:[%s1912_s1 + $0x590] sm:$0xff] }
  0x43   :  { %1070 = vmatpush3.msra.mxu1 %v141_v63  ;;  %1036 = vmatprep.subr.mxu0 %v124_v0  ;;  %v221_v63 = vld [vmem:[%s1912_s1 + $0x588] sm:$0xff]  ;;  %v220_v0 = vld [vmem:[%s1912_s1 + $0x580] sm:$0xff] }
  0x44   :  { %1071 = vmatprep.subr.mxu1 %v156_v1  ;;  %1037 = vmatpush3.msra.mxu0 %v108_v2  ;;  %v42_v1 = vld [vmem:[%s1913_s0 + $0x50] sm:$0xff]  ;;  %v664_v2 = vld [vmem:[%s1914_s3 + $0x18] sm:$0xff] }
  0x45   :  { %444 = vmatprep.mubr.f32.mxu0 %v37_v3  ;;  %1072 = vmatpush3.msra.mxu1 %v140_v4  ;;  %v663_v3 = vld [vmem:[%s1914_s3 + $0x10] sm:$0xff]  ;;  %v662_v4 = vld [vmem:[%s1914_s3 + $0x8] sm:$0xff] }
  0x46   :  { %514 = vmatprep.mubr.f32.mxu1 %v39_v5  ;;  %445 = vmatmul.mubr.f32.vlgmr.msra.gmra.mxu0 %v36_v6  ;;  %v661_v5 = vld [vmem:[%s1914_s3] sm:$0xff] }
  0x47   :  { %515 = vmatmul.mubr.f32.vlgmr.msra.gmra.mxu1 %v38_v7  ;;  %1076 = vmatprep.subr.mxu0 %v203_v8 }
  0x48   :  { %590 = vmatprep.subr.mxu1 %v1173_v12  ;;  %1077 = vmatpush3.msra.mxu0 %v187_v9 }
  0x49   :  { %591 = vmatpush1.msra.mxu1 %v219_v10  ;;  %1078 = vmatprep.subr.mxu0 %v202_v11  ;;  %v927_v11 = vld [vmem:[%s1915_s2] ss:$0 sm:$0xff] }
  0x4a   :  { %592 = vmatprep.subr.mxu1 %v1173_v12  ;;  %1079 = vmatpush3.msra.mxu0 %v186_v13 }
  0x4b   :  { %593 = vmatpush1.msra.mxu1 %v218_v14  ;;  %1080 = vmatprep.subr.mxu0 %v201_v15 }
  0x4c   :  { %594 = vmatprep.subr.mxu1 %v1173_v12  ;;  %1081 = vmatpush3.msra.mxu0 %v185_v16 }
  0x4d   :  { %595 = vmatpush1.msra.mxu1 %v217_v17  ;;  %1082 = vmatprep.subr.mxu0 %v200_v18 }
  0x4e   :  { %596 = vmatprep.subr.mxu1 %v1173_v12  ;;  %1083 = vmatpush3.msra.mxu0 %v184_v19 }
  0x4f   :  { %597 = vmatpush1.msra.mxu1 %v216_v20  ;;  %1084 = vmatprep.subr.mxu0 %v199_v21 }
  0x50   :  { %598 = vmatprep.subr.mxu1 %v1173_v12  ;;  %1085 = vmatpush3.msra.mxu0 %v183_v22 }
  0x51   :  { %599 = vmatpush1.msra.mxu1 %v215_v23  ;;  %1086 = vmatprep.subr.mxu0 %v198_v24 }
  0x52   :  { %600 = vmatprep.subr.mxu1 %v1173_v12  ;;  %1087 = vmatpush3.msra.mxu0 %v182_v25 }
  0x53   :  { %601 = vmatpush1.msra.mxu1 %v214_v26  ;;  %1088 = vmatprep.subr.mxu0 %v197_v27 }
  0x54   :  { %602 = vmatprep.subr.mxu1 %v1173_v12  ;;  %1089 = vmatpush3.msra.mxu0 %v181_v28 }
  0x55   :  { %603 = vmatpush1.msra.mxu1 %v213_v29  ;;  %1090 = vmatprep.subr.mxu0 %v196_v30 }
  0x56   :  { %604 = vmatprep.subr.mxu1 %v1173_v12  ;;  %1091 = vmatpush3.msra.mxu0 %v180_v31 }
  0x57   :  { %605 = vmatpush1.msra.mxu1 %v212_v32  ;;  %1092 = vmatprep.subr.mxu0 %v195_v33  ;;  %v754_v32 = vld [vmem:[%s1916_s5 + $0x38] sm:$0xff]  ;;  %v753_v33 = vld [vmem:[%s1916_s5 + $0x30] sm:$0xff] }
  0x58   :  { %606 = vmatprep.subr.mxu1 %v1173_v12  ;;  %1093 = vmatpush3.msra.mxu0 %v179_v34  ;;  %v752_v34 = vld [vmem:[%s1916_s5 + $0x28] sm:$0xff] }
  0x59   :  { %607 = vmatpush1.msra.mxu1 %v211_v35  ;;  %1094 = vmatprep.subr.mxu0 %v194_v36  ;;  %v751_v35 = vld [vmem:[%s1916_s5 + $0x20] sm:$0xff]  ;;  %v750_v36 = vld [vmem:[%s1916_s5 + $0x18] sm:$0xff] }
  0x5a   :  { %608 = vmatprep.subr.mxu1 %v1173_v12  ;;  %1095 = vmatpush3.msra.mxu0 %v178_v37  ;;  %v749_v37 = vld [vmem:[%s1916_s5 + $0x10] sm:$0xff] }
  0x5b   :  { %609 = vmatpush1.msra.mxu1 %v210_v38  ;;  %1096 = vmatprep.subr.mxu0 %v193_v39  ;;  %v748_v38 = vld [vmem:[%s1916_s5 + $0x8] sm:$0xff]  ;;  %v747_v39 = vld [vmem:[%s1916_s5] sm:$0xff] }
  0x5c   :  { %610 = vmatprep.subr.mxu1 %v1173_v12  ;;  %1097 = vmatpush3.msra.mxu0 %v177_v40  ;;  %v840_v40 = vld [vmem:[%s1917_s7 + $0x18] sm:$0xff] }
  0x5d   :  { %611 = vmatpush1.msra.mxu1 %v209_v41  ;;  %1098 = vmatprep.subr.mxu0 %v192_v42  ;;  %v930_v41 = vld [vmem:[%s1918_s4] ss:$0 sm:$0xff] }
  0x5e   :  { %612 = vmatprep.subr.mxu1 %v1173_v12  ;;  %1099 = vmatpush3.msra.mxu0 %v176_v43 }
  0x5f   :  { %613 = vmatpush1.msra.mxu1 %v208_v44  ;;  %1100 = vmatprep.subr.mxu0 %v191_v45 }
  0x60   :  { %614 = vmatprep.subr.mxu1 %v1173_v12  ;;  %1101 = vmatpush3.msra.mxu0 %v175_v46  ;;  %v839_v46 = vld [vmem:[%s1917_s7 + $0x10] sm:$0xff] }
  0x61   :  { %615 = vmatpush1.msra.mxu1 %v207_v47  ;;  %1102 = vmatprep.subr.mxu0 %v190_v48  ;;  %v838_v47 = vld [vmem:[%s1917_s7 + $0x8] sm:$0xff]  ;;  %v837_v48 = vld [vmem:[%s1917_s7] sm:$0xff] }
  0x62   :  { %616 = vmatprep.subr.mxu1 %v1173_v12  ;;  %1103 = vmatpush3.msra.mxu0 %v174_v49  ;;  %v932_v49 = vld [vmem:[%s1919_s6] ss:$0 sm:$0xff] }
  0x63   :  { %617 = vmatpush1.msra.mxu1 %v206_v50  ;;  %1104 = vmatprep.subr.mxu0 %v189_v51 }
  0x64   :  { %618 = vmatprep.subr.mxu1 %v1173_v12  ;;  %1105 = vmatpush3.msra.mxu0 %v173_v52 }
  0x65   :  { %619 = vmatpush1.msra.mxu1 %v205_v53  ;;  %1106 = vmatprep.subr.mxu0 %v188_v54  ;;  %v934_v54 = vld [vmem:[%s1920_s8] ss:$0 sm:$0xff] }
  0x66   :  { %620 = vmatprep.subr.mxu1 %v1173_v12  ;;  %1107 = vmatpush3.msra.mxu0 %v172_v55 }
  0x67   :  { %584 = vmatprep.mubr.f32.mxu0 %v41_v56  ;;  %621 = vmatpush1.msra.mxu1 %v204_v57 }
  0x68   :  { %585 = vmatmul.mubr.f32.vlgmr.msra.gmra.mxu0 %v40_v58  ;;  %644 = vmatprep.subr.mxu1 %v1173_v12 }
  0x69   :  { %929 = vmatprep.mubr.msk.f32.mxu1 %vm232_vm0, %v43_v59  ;;  %928 = vmatpush2.msk.msra.mxu1 %vm236_vm1, %v224_v60 }
  0x6a   :  { %1130 = vmatprep.subr.mxu0 %v1173_v12  ;;  %646 = vmatprep.subr.mxu1 %v1173_v12 }
  0x6b   :  { %647 = vmatpush2.msra.mxu1 %v223_v61  ;;  %1131 = vmatpush3.msra.mxu0 %v664_v2 }
  0x6c   :  { %648 = vmatprep.subr.mxu1 %v1173_v12  ;;  %1132 = vmatprep.subr.mxu0 %v1173_v12 }
  0x6d   :  { %649 = vmatpush2.msra.mxu1 %v222_v62  ;;  %1133 = vmatpush3.msra.mxu0 %v663_v3 }
  0x6e   :  { %650 = vmatprep.subr.mxu1 %v1173_v12  ;;  %1134 = vmatprep.subr.mxu0 %v1173_v12 }
  0x6f   :  { %651 = vmatpush2.msra.mxu1 %v221_v63  ;;  %1135 = vmatpush3.msra.mxu0 %v662_v4 }
  0x70   :  { %652 = vmatprep.subr.mxu1 %v1173_v12  ;;  %1136 = vmatprep.subr.mxu0 %v1173_v12 }
  0x71   :  { %653 = vmatpush2.msra.mxu1 %v220_v0  ;;  %1137 = vmatpush3.msra.mxu0 %v661_v5 }
  0x72   :  { %655 = vmatmul.mubr.f32.vlgmr.msra.gmra.mxu1 %v42_v1  ;;  %1160 = vmatprep.subr.mxu1 %v1173_v12 }
  0x73   :  { %1138 = vmatprep.mubr.msk.f32.mxu0 %vm1174_vm2, %v1173_v12  ;;  %1141 = vmatprep.subr.mxu0 %v1173_v12 }
  0x74   :  { %1168 = vmatprep.mubr.msk.f32.mxu1 %vm1174_vm2, %v1173_v12  ;;  %1161 = vmatpush3.msra.mxu1 %v840_v40 }
  0x75   :  { %1162 = vmatprep.subr.mxu1 %v1173_v12 }
  0x76   :  { %1163 = vmatpush3.msra.mxu1 %v839_v46 }
  0x77   :  { %1164 = vmatprep.subr.mxu1 %v1173_v12 }
  0x78   :  { %1165 = vmatpush3.msra.mxu1 %v838_v47 }
  0x79   :  { %1166 = vmatprep.subr.mxu1 %v1173_v12 }
  0x7a   :  { %1167 = vmatpush3.msra.mxu1 %v837_v48 }
  0xe4   :  { %v968_v6 = vpop.f32.mrf.mxu0 }
  0xe5   :  { %v1003_v8 = vpop.f32.mrf.mxu1 }
  0xe6   :  { %v969_v7 = vpop.f32.mrf.mxu0 }
  0xe7   :  { %v970_v10 = vadd.f32 %v969_v7, %v968_v6  ;;  %v1004_v13 = vpop.f32.mrf.mxu1 }
  0xe8   :  { %v1005_v17 = vadd.f32 %v1004_v13, %v1003_v8 }
  0xe9   :  { %v307_v15 = vadd.f32 %v970_v10, %v927_v11 }
  0xeb   :  { %v377_v20 = vadd.f32 %v1005_v17, %v307_v15 }
 0x106   :  { %v1038_v9 = vpop.f32.mrf.mxu0 }
 0x107   :  { %v1073_v16 = vpop.f32.mrf.mxu1 }
 0x108   :  { %v1039_v14 = vpop.f32.mrf.mxu0 }
 0x109   :  { %v1040_v18 = vadd.f32 %v1039_v14, %v1038_v9  ;;  %v1074_v21 = vpop.f32.mrf.mxu1 }
 0x10a   :  { %v1075_v24 = vadd.f32 %v1074_v21, %v1073_v16 }
 0x10b   :  { %v447_v23 = vadd.f32 %v1040_v18, %v377_v20 }
 0x10d   :  { %v517_v26 = vadd.f32 %v1075_v24, %v447_v23 }
 0x128   :  { %v1108_v19 = vpop.f32.mrf.mxu0 }
 0x12a   :  { %v1109_v22 = vpop.f32.mrf.mxu0 }
 0x12b   :  { %v1110_v25 = vadd.f32 %v1109_v22, %v1108_v19 }
 0x12d   :  { %v587_v27 = vadd.f32 %v1110_v25, %v517_v26 }
 0x132   :  { %v656_v28 = vpop.f32.mrf.mxu1 }
 0x133   :  { %v657_v29 = vadd.f32 %v656_v28, %v587_v27 }
 0x134   :  { %v658_v30 = vpop.f32.mrf.mxu1 }
 0x135   :  { %v660_v31 = vmax.f32 %v657_v29, 0.0 }
 0x137   :  { %1139 = vmatmul.mubr.msk.f32.vlgmr.msra.gmra.mxu0 %vm672_vm3, %v660_v31 }
 0x138   :  { %1142 = vmatpush3.msra.mxu0 %v754_v32  ;;  %1157 = vmatprep.mubr.msk.f32.mxu0 %vm1174_vm2, %v1173_v12 }
 0x139   :  { %1143 = vmatprep.subr.mxu0 %v1173_v12 }
 0x13a   :  { %1144 = vmatpush3.msra.mxu0 %v753_v33 }
 0x13b   :  { %1145 = vmatprep.subr.mxu0 %v1173_v12 }
 0x13c   :  { %1146 = vmatpush3.msra.mxu0 %v752_v34 }
 0x13d   :  { %1147 = vmatprep.subr.mxu0 %v1173_v12 }
 0x13e   :  { %1148 = vmatpush3.msra.mxu0 %v751_v35 }
 0x13f   :  { %1149 = vmatprep.subr.mxu0 %v1173_v12 }
 0x140   :  { %1150 = vmatpush3.msra.mxu0 %v750_v36 }
 0x141   :  { %1151 = vmatprep.subr.mxu0 %v1173_v12 }
 0x142   :  { %1152 = vmatpush3.msra.mxu0 %v749_v37 }
 0x143   :  { %1153 = vmatprep.subr.mxu0 %v1173_v12 }
 0x144   :  { %1154 = vmatpush3.msra.mxu0 %v748_v38 }
 0x145   :  { %1155 = vmatprep.subr.mxu0 %v1173_v12 }
 0x146   :  { %1156 = vmatpush3.msra.mxu0 %v747_v39 }
 0x1f7   :  { %v742_v42 = vpop.f32.mrf.mxu0 }
 0x1f8   :  { %v743_v43 = vadd.f32 %v930_v41, %v742_v42 }
 0x1f9   :  { %v1140_v44 = vpop.f32.mrf.mxu0 }
 0x1fa   :  { %v746_v45 = vmax.f32 %v743_v43, 0.0 }
 0x1fc   :  { %1158 = vmatmul.mubr.msk.f32.vlgmr.msra.gmra.mxu0 %vm762_vm4, %v746_v45 }
 0x2bc   :  { %v832_v50 = vpop.f32.mrf.mxu0 }
 0x2bd   :  { %v833_v51 = vadd.f32 %v932_v49, %v832_v50 }
 0x2be   :  { %v1159_v52 = vpop.f32.mrf.mxu0 }
 0x2bf   :  { %v836_v53 = vmax.f32 %v833_v51, 0.0 }
 0x2c1   :  { %1169 = vmatmul.mubr.msk.f32.vlgmr.msra.gmra.mxu1 %vm672_vm3, %v836_v53 }
 0x381   :  { %v917_v12 = vpop.f32.mrf.mxu1 }
 0x382   :  { %v918_v55 = vadd.f32 %v934_v54, %v917_v12 }
 0x383   :  { %v1170_v56 = vpop.f32.mrf.mxu1 }
 0x384   :  { %922 = vst.msk [vmem:[%s1921_s9] sm:$0xff] %vm921_vm5, %v918_v55 }

</bundles_post_ra>
